<compile_context>
chip_gen: v6e
topology: v6e:2x2x1
jax: 0.10.0
libtpu: 0.0.40
codegen_flags: <defaults>
</compile_context>

<pallas_src>
import functools
import math

import jax
import jax.numpy as jnp
from jax.experimental import pallas as pl
from jax.experimental.pallas import tpu as pltpu


@functools.lru_cache(maxsize=1)
def _vmem_limit_bytes():
    """32 MiB is safe everywhere (v7x has 64 MiB/TC); v5e/v6e (128 MiB) get 64 MiB."""
    try:
        kind = jax.devices()[0].device_kind.lower()
    except Exception:
        return 32 * 1024 * 1024
    if ("v5" in kind) or ("v6" in kind):
        return 64 * 1024 * 1024
    return 32 * 1024 * 1024


def _round_up(x, m):
    return ((x + m - 1) // m) * m


def _pick_tile(total, target_cols, align=128):
    """Largest multiple of `align` dividing `total` and <= target (total % align == 0)."""
    assert total % align == 0, f"pad the point dimension to a multiple of {align}"
    t = min(total, max(align, (int(target_cols) // align) * align))
    while total % t != 0:
        t -= align
    return t


# ---------------------------------------------------------------------------
# Pallas kernel 1: 1x1 Conv1d (pointwise conv == channel matmul), N-tiled
# ---------------------------------------------------------------------------

def _pconv_kernel(x_ref, w_ref, b_ref, o_ref):
    # lane dim = points (multiple of 128 after padding) -> dense MXU matmul,
    # lane-dense unmasked stores. bf16 input is upcast to f32 on the VPU (hidden,
    # kernel is memory-bound); accumulation stays f32.
    x = x_ref[0].astype(jnp.float32)
    o_ref[0] = (jnp.dot(w_ref[...], x, preferred_element_type=jnp.float32)
                + b_ref[...]).astype(o_ref.dtype)


def pointwise_conv1d(x, w, b, *, out_dtype=None, vmem_budget=8 * 1024 * 1024):
    """x: [B, Cin, N], w: [Cout, Cin], b: [Cout] -> [B, Cout, N] (out_dtype)."""
    B, Cin, N = x.shape
    Cout = w.shape[0]
    out_dtype = out_dtype or x.dtype
    Np = _round_up(N, 128)
    xp = x if Np == N else jnp.pad(x, ((0, 0), (0, 0), (0, Np - N)))

    e_in = jnp.dtype(x.dtype).itemsize
    e_out = jnp.dtype(out_dtype).itemsize
    # double-buffered in/out blocks + in-kernel f32 temporaries, per point column
    per_col = 2 * Cin * e_in + 2 * Cout * e_out + 4 * (Cin + Cout)
    TN = _pick_tile(Np, max(128, vmem_budget // per_col))
    grid = (B, Np // TN)

    out = pl.pallas_call(
        _pconv_kernel,
        out_shape=jax.ShapeDtypeStruct((B, Cout, Np), out_dtype),
        grid=grid,
        in_specs=[
            pl.BlockSpec((1, Cin, TN), lambda bi, ni: (bi, 0, ni)),
            pl.BlockSpec((Cout, Cin), lambda bi, ni: (0, 0)),
            pl.BlockSpec((Cout, 1), lambda bi, ni: (0, 0)),
        ],
        out_specs=pl.BlockSpec((1, Cout, TN), lambda bi, ni: (bi, 0, ni)),
        compiler_params=pltpu.CompilerParams(
            dimension_semantics=("parallel", "parallel"),
            vmem_limit_bytes=_vmem_limit_bytes()),
    )(xp, w, b.reshape(Cout, 1))
    return out if Np == N else out[:, :, :N]


# ---------------------------------------------------------------------------
# Pallas kernel 2: fused DirectionalEncoding + linear_after(max_K fj) + skipconv + add
# ---------------------------------------------------------------------------

def _gelu_tanh(x):
    # tanh-approx GELU: EUP tanh instead of a VALU-heavy erf polynomial.
    c = 0.7978845608028654  # sqrt(2/pi)
    return 0.5 * x * (1.0 + jnp.tanh(c * (x + 0.044715 * x * x * x)))


def _encode_finalize_kernel(dp_ref, fj_ref, fi_ref, v_ref, w1_ref, s1_ref, t1_ref,
                            w2_ref, b2_ref, ws_ref, bs_ref, las_ref, lat_ref, o_ref):
    K = dp_ref.shape[2]

    # --- DirectionalEncoding: normalize(dp) . dir_vectors, max over K, MLP ---
    dpx = dp_ref[0, 0].astype(jnp.float32)            # [K, TM] (K sublanes, M lanes)
    dpy = dp_ref[0, 1].astype(jnp.float32)
    dpz = dp_ref[0, 2].astype(jnp.float32)
    inv = jax.lax.rsqrt(jnp.maximum(dpx * dpx + dpy * dpy + dpz * dpz, 1e-24))  # EUP
    xn, yn, zn = dpx * inv, dpy * inv, dpz * inv

    v = v_ref[...]                                    # [D, 3] (rows L2-normalized)
    vx, vy, vz = v[:, 0:1], v[:, 1:2], v[:, 2:3]      # [D, 1]
    # K-loop of [D, TM] slabs: live state stays [D, TM] (no [D,K,TM] spill, no
    # sublane reduce). Pure VPU work, hidden behind the fj HBM stream.
    theta_max = vx * xn[0:1, :] + vy * yn[0:1, :] + vz * zn[0:1, :]    # [D, TM]
    for k in range(1, K):
        theta_k = vx * xn[k:k + 1, :] + vy * yn[k:k + 1, :] + vz * zn[k:k + 1, :]
        theta_max = jnp.maximum(theta_max, theta_k)

    h = jnp.dot(w1_ref[...], theta_max, preferred_element_type=jnp.float32)
    h = h * s1_ref[...] + t1_ref[...]                 # folded BatchNorm1d (eval)
    h = _gelu_tanh(h)
    pe = jnp.dot(w2_ref[...], h, preferred_element_type=jnp.float32) + b2_ref[...]

    # --- identity = skipconv(gather(f, idx)) (1x1 Conv1d) ---
    ident = (jnp.dot(ws_ref[...], fi_ref[0], preferred_element_type=jnp.float32)
             + bs_ref[...])                           # [Cout, TM]

    # --- f = BN(max_K fj) + pe + identity ---
    # fj block is [Cout, K, TM]: max over the sublane K axis, output lane-dense.
    fmax = jnp.max(fj_ref[0].astype(jnp.float32), axis=1)     # [Cout, TM]
    f = fmax * las_ref[...] + lat_ref[...]            # folded BatchNorm1d (eval)
    o_ref[0] = (f + pe + ident).astype(o_ref.dtype)


def encode_and_finalize(dp, fj, fi, v_norm, prm, *, vmem_budget=8 * 1024 * 1024):
    """dp: [B,3,K,M] bf16, fj: [B,Cout,K,M] bf16, fi: [B,Cin,M] f32 -> [B,Cout,M] f32."""
    B, _, K, M = dp.shape
    Cout = fj.shape[1]
    Cin = fi.shape[1]
    D = v_norm.shape[0]
    C2 = prm['de_w1'].shape[0]
    assert M % 128 == 0, "pad M to a multiple of 128 in the caller"

    e_dp = jnp.dtype(dp.dtype).itemsize
    e_fj = jnp.dtype(fj.dtype).itemsize
    e_fi = jnp.dtype(fi.dtype).itemsize
    # Per-M-column VMEM bytes: double-buffered blocks + in-kernel f32 temporaries
    # (dp upcasts/normalization, fj upcast for the max, theta slabs, h/pe/ident/f).
    per_col = (2 * 3 * K * e_dp + 2 * K * Cout * e_fj + 2 * Cin * e_fi + 2 * Cout * 4
               + 4 * (7 * K + K * Cout + 2 * D + 2 * C2 + 5 * Cout))
    TM = _pick_tile(M, max(128, vmem_budget // per_col))
    grid = (B, M // TM)

    return pl.pallas_call(
        _encode_finalize_kernel,
        out_shape=jax.ShapeDtypeStruct((B, Cout, M), jnp.float32),
        grid=grid,
        in_specs=[
            pl.BlockSpec((1, 3, K, TM), lambda bi, mi: (bi, 0, 0, mi)),
            pl.BlockSpec((1, Cout, K, TM), lambda bi, mi: (bi, 0, 0, mi)),
            pl.BlockSpec((1, Cin, TM), lambda bi, mi: (bi, 0, mi)),
            pl.BlockSpec((D, 3), lambda bi, mi: (0, 0)),
            pl.BlockSpec((C2, D), lambda bi, mi: (0, 0)),
            pl.BlockSpec((C2, 1), lambda bi, mi: (0, 0)),
            pl.BlockSpec((C2, 1), lambda bi, mi: (0, 0)),
            pl.BlockSpec((Cout, C2), lambda bi, mi: (0, 0)),
            pl.BlockSpec((Cout, 1), lambda bi, mi: (0, 0)),
            pl.BlockSpec((Cout, Cin), lambda bi, mi: (0, 0)),
            pl.BlockSpec((Cout, 1), lambda bi, mi: (0, 0)),
            pl.BlockSpec((Cout, 1), lambda bi, mi: (0, 0)),
            pl.BlockSpec((Cout, 1), lambda bi, mi: (0, 0)),
        ],
        out_specs=pl.BlockSpec((1, Cout, TM), lambda bi, mi: (bi, 0, mi)),
        compiler_params=pltpu.CompilerParams(
            dimension_semantics=("parallel", "parallel"),
            vmem_limit_bytes=_vmem_limit_bytes()),
    )(dp, fj, fi,
      v_norm, prm['de_w1'],
      prm['de_bn_scale'].reshape(C2, 1), prm['de_bn_shift'].reshape(C2, 1),
      prm['de_w2'], prm['de_b2'].reshape(Cout, 1),
      prm['skip_w'], prm['skip_b'].reshape(Cout, 1),
      prm['la_scale'].reshape(Cout, 1), prm['la_shift'].reshape(Cout, 1))


# ---------------------------------------------------------------------------
# Plain-JAX glue (data-dependent sampling / neighbor gathering)
# ---------------------------------------------------------------------------

def furthest_point_sample(p, m):
    # TODO(synk): FPS is inherently sequential scalar work (device-wide argmax per
    # sample); a Pallas FPS keeping the running min-distance vector in VMEM is the
    # highest-value follow-up at production N.
    B, N, _ = p.shape

    def one(pts):
        def body(i, state):
            dists, idxs = state
            last = pts[idxs[i - 1]]
            d = jnp.sum((pts - last) ** 2, axis=-1)
            dists = jnp.minimum(dists, d)
            idxs = idxs.at[i].set(jnp.argmax(dists).astype(jnp.int32))
            return dists, idxs

        dists0 = jnp.full((N,), 1e10, dtype=pts.dtype)
        idxs0 = jnp.zeros((m,), dtype=jnp.int32)  # pointnet2 semantics: start at idx 0
        _, idxs = jax.lax.fori_loop(1, m, body, (dists0, idxs0))
        return idxs

    return jax.vmap(one)(p)


def ball_query(radius, nsample, support, query):
    # TODO(synk): data-dependent neighbor search kept as plain-JAX glue; a tiled
    # Pallas distance+select kernel would avoid the [B, M, N] d2 matrix which
    # dominates HBM traffic at production sizes.
    N = support.shape[1]
    d2 = jnp.sum((query[:, :, None, :] - support[:, None, :, :]) ** 2, axis=-1)
    ar = jnp.arange(N, dtype=jnp.int32)
    # First `nsample` in-radius indices in ascending order via top_k on the negated index.
    neg = jnp.where(d2 < radius * radius, -ar[None, None, :], -N)
    vals, _ = jax.lax.top_k(neg, nsample)
    cand = -vals                                  # ascending; == N where out of radius
    first = cand[:, :, :1]
    # Every query point is itself a support point (d2 == 0 < radius^2), so slot 0 is
    # always valid; padding short neighborhoods with it matches pointnet2 semantics.
    return jnp.where(cand == N, first, cand).astype(jnp.int32)


def _gather_pts(pts, idx):   # pts [N,3], idx [...] -> [..., 3]
    return pts[idx]


def _gather_feats(f, idx):   # f [C,N], idx [...] -> [C, ...]
    return f[:, idx]


# ---------------------------------------------------------------------------
# Parameters (deterministic, PyTorch-default-style init)
# ---------------------------------------------------------------------------

def init_params(key, cin, cout, num_dir=32):
    ks = jax.random.split(key, 8)

    def conv_init(k, co, ci, bias=True):
        bound = 1.0 / math.sqrt(ci)
        kw, kb = jax.random.split(k)
        w = jax.random.uniform(kw, (co, ci), jnp.float32, -bound, bound)
        b = jax.random.uniform(kb, (co,), jnp.float32, -bound, bound) if bias else None
        return w, b

    def bn_init(k, c):
        k1, k2, k3, k4 = jax.random.split(k, 4)
        gamma = 1.0 + 0.1 * jax.random.normal(k1, (c,), jnp.float32)
        beta = 0.1 * jax.random.normal(k2, (c,), jnp.float32)
        mean = 0.1 * jax.random.normal(k3, (c,), jnp.float32)
        var = jax.random.uniform(k4, (c,), jnp.float32, 0.5, 1.5)
        scale = gamma / jnp.sqrt(var + 1e-5)
        shift = beta - mean * scale
        return scale, shift

    prm = {}
    prm['skip_w'], prm['skip_b'] = conv_init(ks[0], cout, cin)          # skipconv Conv1d
    prm['conv1_w'], prm['conv1_b'] = conv_init(ks[1], cout, cin)        # convs1 Conv1d
    prm['la_scale'], prm['la_shift'] = bn_init(ks[2], cout)             # linear_after BN
    prm['dir_vectors'] = jax.random.normal(ks[3], (num_dir, 3), jnp.float32)
    prm['de_w1'], _ = conv_init(ks[4], cout // 2, num_dir, bias=False)  # DE Conv1d no bias
    prm['de_bn_scale'], prm['de_bn_shift'] = bn_init(ks[5], cout // 2)  # DE BN
    prm['de_w2'], prm['de_b2'] = conv_init(ks[6], cout, cout // 2)      # DE Conv1d
    return prm


# ---------------------------------------------------------------------------
# Forward (Pallas) and pure-JAX reference
# ---------------------------------------------------------------------------

def set_abstraction_forward(p, f, params, *, stride=4, radius=0.3, nsample=16):
    B, N, _ = p.shape
    M = N // stride
    Np = _round_up(N, 128)
    Mp = _round_up(M, 128)

    # convs1: 1x1 Conv1d. bf16 storage (HBM-bound), N padded so blocks are lane-dense.
    f_bf16 = f.astype(jnp.bfloat16)
    f_pad = f_bf16 if Np == N else jnp.pad(f_bf16, ((0, 0), (0, 0), (0, Np - N)))
    fconv = pointwise_conv1d(f_pad, params['conv1_w'], params['conv1_b'],
                             out_dtype=jnp.bfloat16)               # [B, Cout, Np] bf16

    # FPS; pad the (tiny) sampled-index array to Mp so every downstream gather is
    # already lane-dense width (padding duplicates the first sample, sliced off later).
    fps_idx = furthest_point_sample(p, M)                          # [B, M]
    if Mp != M:
        fps_idx = jnp.concatenate(
            [fps_idx, jnp.broadcast_to(fps_idx[:, :1], (B, Mp - M))], axis=1)
    new_p = jax.vmap(_gather_pts)(p, fps_idx)                      # [B, Mp, 3]
    fi = jax.vmap(_gather_feats)(f, fps_idx)                       # [B, Cin, Mp] f32

    # Ball-query neighborhoods; transpose the tiny idx array (not the K-expanded fj).
    idx = ball_query(radius, nsample, p, new_p)                    # [B, Mp, K]
    idx_t = jnp.transpose(idx, (0, 2, 1))                          # [B, K, Mp]

    gp = jax.vmap(_gather_pts)(p, idx_t)                           # [B, K, Mp, 3]
    dp = (jnp.transpose(gp, (0, 3, 1, 2))
          - jnp.transpose(new_p, (0, 2, 1))[:, :, None, :]).astype(jnp.bfloat16)  # [B,3,K,Mp]

    # TODO(synk): fuse this gather into the fused kernel (scalar-prefetch idx_t, keep
    # fconv resident per batch) so the K-expanded fj never round-trips through HBM.
    fj = jax.vmap(_gather_feats)(fconv, idx_t)                     # [B, Cout, K, Mp] bf16

    v = params['dir_vectors']
    v_norm = v / jnp.maximum(jnp.linalg.norm(v, axis=1, keepdims=True), 1e-12)

    f_out = encode_and_finalize(dp, fj, fi, v_norm, params)        # [B, Cout, Mp] f32
    return new_p[:, :M, :], f_out[:, :, :M], None


def reference_forward(p, f, params, *, stride=4, radius=0.3, nsample=16):
    hi = jax.lax.Precision.HIGHEST
    B, N, _ = p.shape
    M = N // stride
    fps_idx = furthest_point_sample(p, M)
    new_p = jax.vmap(_gather_pts)(p, fps_idx)
    fi = jax.vmap(_gather_feats)(f, fps_idx)
    identity = (jnp.einsum('oc,bcm->bom', params['skip_w'], fi, precision=hi)
                + params['skip_b'][None, :, None])
    fconv = (jnp.einsum('oc,bcn->bon', params['conv1_w'], f, precision=hi)
             + params['conv1_b'][None, :, None])
    idx = ball_query(radius, nsample, p, new_p)
    grouped_p = jax.vmap(_gather_pts)(p, idx)
    dp = jnp.transpose(grouped_p - new_p[:, :, None, :], (0, 3, 1, 2))   # [B, 3, M, K]
    fj = jax.vmap(_gather_feats)(fconv, idx)                             # [B, Cout, M, K]
    dp_norm = dp / jnp.maximum(jnp.linalg.norm(dp, axis=1, keepdims=True), 1e-12)
    v = params['dir_vectors']
    v_norm = v / jnp.maximum(jnp.linalg.norm(v, axis=1, keepdims=True), 1e-12)
    theta = jnp.einsum('dc,bcmk->bdmk', v_norm, dp_norm, precision=hi)
    theta_max = jnp.max(theta, axis=-1)
    h = jnp.einsum('oc,bcm->bom', params['de_w1'], theta_max, precision=hi)
    h = h * params['de_bn_scale'][None, :, None] + params['de_bn_shift'][None, :, None]
    h = 0.5 * h * (1.0 + jax.lax.erf(h / jnp.sqrt(2.0)))             # exact GELU
    pe = (jnp.einsum('oc,bcm->bom', params['de_w2'], h, precision=hi)
          + params['de_b2'][None, :, None])
    fmax = jnp.max(fj, axis=-1)
    f_out = fmax * params['la_scale'][None, :, None] + params['la_shift'][None, :, None]
    f_out = f_out + pe + identity
    return new_p, f_out, None


if __name__ == "__main__":
    key = jax.random.PRNGKey(0)
    kp, kf, kparams = jax.random.split(key, 3)
    B, N, Cin, Cout = 2, 64, 16, 32
    stride, radius, nsample = 4, 0.3, 16

    p = jax.random.uniform(kp, (B, N, 3), jnp.float32)       # points in unit cube
    f = jax.random.normal(kf, (B, Cin, N), jnp.float32)      # channels-first features
    params = init_params(kparams, Cin, Cout)

    new_p, f_out, _ = set_abstraction_forward(
        p, f, params, stride=stride, radius=radius, nsample=nsample)
    jax.block_until_ready(f_out)

    ref_p, ref_f, _ = reference_forward(
        p, f, params, stride=stride, radius=radius, nsample=nsample)
    jax.block_until_ready(ref_f)

    assert new_p.shape == (B, N // stride, 3)
    assert f_out.shape == (B, Cout, N // stride)
    perr = float(jnp.max(jnp.abs(new_p - ref_p)))
    assert perr == 0.0, f"point mismatch {perr}"
    # Tolerance covers bf16 storage of the fconv/fj/dp streams and tanh-approx GELU.
    err = float(jnp.max(jnp.abs(f_out - ref_f)))
    assert err < 1e-1, f"max abs err {err}"
    print("KERNEL_OK")
</pallas_src>

<mosaic_0001>
module attributes {stable_mosaic.version = 11 : i64} {
  func.func @_pconv_kernel(%arg0: i32, %arg1: i32, %arg2: memref<1x16x128xbf16, #tpu.memory_space<vmem>>, %arg3: memref<32x16xf32, #tpu.memory_space<vmem>>, %arg4: memref<32x1xf32, #tpu.memory_space<vmem>>, %arg5: memref<1x32x128xbf16, #tpu.memory_space<vmem>>) attributes {dimension_semantics = [#tpu.dimension_semantics<parallel>, #tpu.dimension_semantics<parallel>], iteration_bounds = array<i64: 2, 1>, scalar_prefetch = 0 : i64, scratch_operands = 0 : i64, tpu.core_type = #tpu.core_type<tc>, window_params = [{transform_indices = @transform_0, window_bounds = array<i64: 1, 16, 128>}, {pipeline_mode = #tpu.pipeline_mode<synchronous>, transform_indices = @transform_1, window_bounds = array<i64: 32, 16>}, {pipeline_mode = #tpu.pipeline_mode<synchronous>, transform_indices = @transform_2, window_bounds = array<i64: 32, 1>}, {transform_indices = @transform_3, window_bounds = array<i64: 1, 32, 128>}]} {
    %c0 = arith.constant 0 : index
    %c0_0 = arith.constant 0 : index
    %c0_1 = arith.constant 0 : index
    %0 = vector.load %arg2[%c0, %c0_0, %c0_1] : memref<1x16x128xbf16, #tpu.memory_space<vmem>>, vector<1x16x128xbf16>
    %1 = vector.shape_cast %0 : vector<1x16x128xbf16> to vector<16x128xbf16>
    %2 = arith.extf %1 : vector<16x128xbf16> to vector<16x128xf32>
    %c0_2 = arith.constant 0 : index
    %c0_3 = arith.constant 0 : index
    %3 = vector.load %arg3[%c0_2, %c0_3] : memref<32x16xf32, #tpu.memory_space<vmem>>, vector<32x16xf32>
    %cst = arith.constant dense<0.000000e+00> : vector<32x128xf32>
    %4 = tpu.matmul %3, %2, %cst {dimension_numbers = #tpu.dot_dimension_numbers<[1], [0], [0], [1], [0, 0, 1, 1], [], []>} : vector<32x16xf32>, vector<16x128xf32>, vector<32x128xf32> -> vector<32x128xf32>
    %c0_4 = arith.constant 0 : index
    %c0_5 = arith.constant 0 : index
    %5 = vector.load %arg4[%c0_4, %c0_5] : memref<32x1xf32, #tpu.memory_space<vmem>>, vector<32x1xf32>
    %6 = vector.broadcast %5 : vector<32x1xf32> to vector<32x128xf32>
    %7 = arith.addf %4, %6 : vector<32x128xf32>
    %8 = arith.truncf %7 : vector<32x128xf32> to vector<32x128xbf16>
    %c0_6 = arith.constant 0 : index
    %c0_7 = arith.constant 0 : index
    %c0_8 = arith.constant 0 : index
    %9 = vector.load %arg5[%c0_6, %c0_7, %c0_8] : memref<1x32x128xbf16, #tpu.memory_space<vmem>>, vector<1x32x128xbf16>
    %10 = vector.shape_cast %9 : vector<1x32x128xbf16> to vector<32x128xbf16>
    %11 = vector.shape_cast %8 : vector<32x128xbf16> to vector<1x32x128xbf16>
    tpu.vector_store %arg5[%c0_6, %c0_7, %c0_8], %11 {strides = array<i32>} : memref<1x32x128xbf16, #tpu.memory_space<vmem>>, vector<1x32x128xbf16>,
    return
  }
  func.func @transform_0(%arg0: i32, %arg1: i32) -> (i32, i32, i32) {
    %c0_i32 = arith.constant 0 : i32
    %c0_i32_0 = arith.constant 0 : i32
    return %arg0, %c0_i32, %arg1 : i32, i32, i32
  }
  func.func @transform_1(%arg0: i32, %arg1: i32) -> (i32, i32) {
    %c0_i32 = arith.constant 0 : i32
    %c0_i32_0 = arith.constant 0 : i32
    %c0_i32_1 = arith.constant 0 : i32
    return %c0_i32, %c0_i32_0 : i32, i32
  }
  func.func @transform_2(%arg0: i32, %arg1: i32) -> (i32, i32) {
    %c0_i32 = arith.constant 0 : i32
    %c0_i32_0 = arith.constant 0 : i32
    %c0_i32_1 = arith.constant 0 : i32
    return %c0_i32, %c0_i32_0 : i32, i32
  }
  func.func @transform_3(%arg0: i32, %arg1: i32) -> (i32, i32, i32) {
    %c0_i32 = arith.constant 0 : i32
    %c0_i32_0 = arith.constant 0 : i32
    return %arg0, %c0_i32, %arg1 : i32, i32, i32
  }
}

</mosaic_0001>

<bundles_post_ra>
// kernel: tpu_custom_call.1
= control target key start
LH: loop header
LB: loop body
LE: loop exit
PB: predicated region body
PF: predicated region fallthrough
CT: control target
= control target key end

     0   :  { %8 = vsyncpa [#allocation3], 0  ;;  %s803_s0 = inlined_call_operand.vmem [shape: bf16[2,16,128], index: 0, kind: input, shape index: {}]   ;;  %s804_s1 = inlined_call_operand.vmem [shape: f32[32,16], index: 1, kind: input, shape index: {}]   ;;  %s805_s2 = inlined_call_operand.vmem [shape: f32[32,1], index: 2, kind: input, shape index: {}]   ;;  %s806_s3 = inlined_call_operand.hbm [shape: bf16[2,32,128], index: 3, kind: output, shape index: {}]  }
   0x1   :  { %10 = vsyncpa [#allocation3 + $0x1], 0  ;;  %s661_s12 = smov 0   ;;  %s663_s13 = smov 0  }
   0x2   :  { %s665_s14 = smov 0   ;;  %s667_s15 = smov 0  }
   0x3   :  { %s669_s16 = smov 0   ;;  %s671_s17 = smov 0  }
   0x4 LB: > { %s437_s18 = sadd.s32 4294967295, %s635_s17   ;;  %s438_s19 = sadd.s32 4294967294, %s635_s17   ;;  %s635_s17 = sphi %s671_s17, %s16_s17   ;;  %s631_s16 = sphi %s669_s16, %s813_s16   ;;  %s627_s15 = sphi %s667_s15, %s812_s15   ;;  %s623_s14 = sphi %s665_s14, %s811_s14   ;;  %s619_s13 = sphi %s663_s13, %s810_s13   ;;  %s615_s12 = sphi %s661_s12, %s809_s12  }
   0x5   : > { %s28_s20 = sadd.s32 1, %s631_s16  ;;  %s107_s21 = sadd.s32 1, %s623_s14 }
   0x6   : > { %p30_p0 = scmp.ge.s32.totalorder %s28_s20, 2  ;;  %p117_p1 = scmp.ne.s32.totalorder %s623_s14, %s619_s13 }
   0x7   : > { %p118_p2 = scmp.eq.s32.totalorder %s437_s18, 1  ;;  %p123_p3 = scmp.ne.s32.totalorder %s619_s13, %s615_s12 }
   0x8   : > { %s815_s20 = smov (%p30_p0, %s28_s20), 0  ;;  %p124_p5 = scmp.eq.s32.totalorder %s438_s19, 1 }
   0x9   : > { %p701_p4 = por %p118_p2, %p117_p1  ;;  %s102_s23 = ssub.s32 %s631_s16, %s815_s20 }
   0xa   : > { %p441_p6 = scmp.ge.s32.totalorder %s635_s17, 1  ;;  %p105_p7 = scmp.eq.s32.totalorder %s102_s23, 0 }
   0xb   : > { %p708_p8 = por %p124_p5, %p123_p3  ;;  %p159_p9 = scmp.lt.s32.totalorder %s635_s17, 3 }
   0xc   : > { %s714_s25 = scalar_select %p105_p7, %s623_s14, %s107_s21  }
   0xd   : > { %p160_p10 = pnand %p441_p6, %p159_p9 }
   0xe   : > { %p186_p11 = scmp.lt.s32.totalorder (!%p160_p10), %s627_s15, 1  ;;  %s183_s30 = sand.u32 (!%p160_p10), 1, %s619_s13  }
   0xf   : > { %163 = sbr.rel (%p160_p10) target bundleno = 245 (0xf5), region = 32  ;;  %s442_s4 = sshll.u32 (!%p160_p10), %s183_s30, 4 }
  0x10   : > { %s185_s5 = scalar_lea.vmem (!%p160_p10), [#allocation2], %s442_s4  ;;  %s638_s18 = smov (!%p160_p10), [#allocation2]  }
  0x11   : > { %s359_s6 = sshll.u32 (!%p160_p10), %s185_s5, 4  ;;  %s563_s19 = sshll.u32 (!%p160_p10), %s638_s18, 4  ;;  %s751_s6 = int_to_ptr.vmem [resolvable:$true] %s359_s6  ;;  %s564_s19 = int_to_ptr.vmem [resolvable:$false] %s563_s19 }
  0x12   : > { %s559_s11 = scalar_lea.vmem (!%p160_p10), %s751_s6, 256  ;;  %s565_s21 = scalar_lea.vmem (!%p160_p10), %s564_s19, 512 }
  0x13   : > { %p560_p12 = scmp.ne.s32.totalorder (!%p160_p10), %s751_s6, %s559_s11  ;;  %p566_p1 = scmp.lt.s32.totalorder (!%p160_p10), %s751_s6, %s564_s19 }
  0x14   : > { %v198_v0 = vld [vmem:[%s804_s1] sm:$0xff]  ;;  %vm226_vm0 = vcmask 130048   ;;  %v200_v1 = vld [vmem:[%s804_s1 + $0x10] sm:$0xff]  ;;  %s187_s7 = scalar_select %p186_p11, %s627_s15, 1  ;;  %v637_v4 = vmov 0   ;;  %v205_v5 = vld [vmem:[%s805_s2 + $0x18] sm:$0xff] }
  0x15   : > { %489 = vmatprep.mubr.msk.f32.mxu0 %vm226_vm0, %v198_v0  ;;  %492 = vmatprep.mubr.msk.f32.mxu1 %vm226_vm0, %v200_v1  ;;  %v204_v2 = vld [vmem:[%s805_s2 + $0x10] sm:$0xff]  ;;  %v202_v3 = vld [vmem:[%s805_s2] sm:$0xff]  ;;  %v203_v6 = vld [vmem:[%s805_s2 + $0x8] sm:$0xff]  ;;  %p561_p13 = pnand %p560_p12, %p701_p4  ;;  %p567_p2 = scmp.lt.s32.totalorder %s565_s21, %s559_s11 }
  0x16   : > { %558 = vset.pattern.permute.xlu1 %v637_v4  ;;  %557 = vset.pattern.permute.xlu0 %v637_v4  ;;  %s458_s8 = sshll.u32 %s187_s7, 3  ;;  %v199_v10 = vld [vmem:[%s804_s1 + $0x8] sm:$0xff]  ;;  %v201_v11 = vld [vmem:[%s804_s1 + $0x18] sm:$0xff]  ;;  %s463_s7 = sshll.u32 %s627_s15, 8 }
  0x17   : > { %218 = vperm.xlu1 %558, %v204_v2   ;;  %208 = vperm.xlu0 %557, %v202_v3   ;;  %s193_s23 = scalar_lea.vmem %s803_s0, %s458_s8  ;;  %s756_s10 = scalar_lea.hbm %s806_s3, %s463_s7 }
  0x18   : > { %v465_v7 = vld [vmem:[%s193_s23] sm:$0xff]   ;;  %s758_s15 = scalar_lea.sflag [#allocation3], %s183_s30  ;;  %p562_p0 = pneg %p561_p13 }
  0x19   : > { %v467_v8 = vunpack.c.h.bf16 %v465_v7  ;;  %v466_v9 = vunpack.c.l.bf16 %v465_v7  ;;  %p568_p3 = por %p567_p2, %p566_p1 }
  0x1b   : > { %223 = vperm.xlu1 %558, %v205_v5   ;;  %213 = vperm.xlu0 %557, %v203_v6   ;;  %p569_p5 = pnand %p568_p3, %p562_p0 }
  0x1c   : > { %485 = vmatprep.subr.mxu0 %v467_v8  ;;  %495 = vmatprep.subr.mxu1 %v467_v8 }
  0x1d   : > { %486 = vmatpush3.msra.mxu0 %v467_v8  ;;  %497 = vmatpush3.msra.mxu1 %v467_v8 }
  0x1e   : > { %487 = vmatprep.subr.mxu0 %v466_v9  ;;  %496 = vmatprep.subr.mxu1 %v466_v9 }
  0x1f   : > { %488 = vmatpush3.msra.mxu0 %v466_v9  ;;  %498 = vmatpush3.msra.mxu1 %v466_v9 }
  0x20   : > { %490 = vmatmul.mubr.msk.f32.vlgmr.msra.gmra.mxu0 %vm226_vm0, %v199_v10  ;;  %493 = vmatmul.mubr.msk.f32.vlgmr.msra.gmra.mxu1 %vm226_vm0, %v201_v11 }
  0x92   : > { %v219_v12 = vpop.permute.xlu1 %218  ;;  %v209_v13 = vpop.permute.xlu0 %208 }
  0x96   : > { %v224_v16 = vpop.permute.xlu1 %223  ;;  %v214_v17 = vpop.permute.xlu0 %213 }
  0xe0   : > { %v491_v14 = vpop.f32.mrf.mxu0  ;;  %v494_v15 = vpop.f32.mrf.mxu1 }
  0xe1   : > { %v311_v20 = vadd.f32 %v491_v14, %v214_v17  ;;  %v321_v21 = vadd.f32 %v494_v15, %v224_v16 }
  0xe2   : > { %v305_v18 = vpop.f32.mrf.mxu0  ;;  %v315_v19 = vpop.f32.mrf.mxu1 }
  0xe3   : > { %v306_v22 = vadd.f32 %v305_v18, %v209_v13  ;;  %v316_v23 = vadd.f32 %v315_v19, %v219_v12 }
  0xe5   : > { %v471_v24 = vpack.c.bf16 %v311_v20, %v306_v22  ;;  %v476_v25 = vpack.c.bf16 %v321_v21, %v316_v23 }
  0xe7   : > { %472 = vst [vmem:[%s185_s5] sm:$0xff] %v471_v24   ;;  %478 = vst [vmem:[%s185_s5 + $0x8] sm:$0xff] %v476_v25  }
  0xe8   : > { %572 = shalt.err (!%p569_p5)
}
  0xe9   : > { %s573_s23 = scalar_lea.hbm %s756_s10, 256  ;;  %s577_s28 = scalar_lea.hbm %s806_s3, 512 }
  0xea   : > { %p574_p6 = scmp.ne.s32.totalorder %s756_s10, %s573_s23  ;;  %p578_p10 = scmp.lt.s32.totalorder %s756_s10, %s806_s3 }
  0xeb   : > { %p579_p11 = scmp.lt.s32.totalorder %s577_s28, %s573_s23 }
  0xec   : > { %p575_p7 = pnand %p574_p6, %p701_p4 }
  0xed   : > { %p580_p12 = por %p579_p11, %p578_p10 }
  0xee   : > { %p576_p9 = pneg %p575_p7 }
  0xf0   : > { %p581_p13 = pnand %p580_p12, %p576_p9 }
  0xf2   : > { %584 = shalt.err (!%p581_p13)
}
  0xf3   : > { %s639_s4 = smov 64   ;;  %s640_s5 = smov 4  }
  0xf4   : > { %499 = dma.vmem_to_hbm [thread:$0]  (%p701_p4), %s751_s6, 256, %s756_s10, %s758_s15, %s639_s4, %s639_s4, %s640_s5  }
  0xf5 PF: > { %p505_p0 = scmp.ge.s32.totalorder %s635_s17, 2  ;;  %s374_s7 = sand.u32 1, %s615_s12  }
  0xf6   : > { %s375_s8 = scalar_lea.sflag [#allocation3], %s374_s7 }
  0xf7   : > { %p502_p1 = pnand %p505_p0, %p708_p8 }
  0xf9   : > { %p503_p2 = pneg %p502_p1 }
  0xfb   : > { %610 = dma.done.wait (%p503_p2), %s375_s8, 256  }
  0xfc   : > { %612 = vsyncadd (%p503_p2), %s375_s8, 4294967040  ;;  %s16_s17 = sadd.s32 1, %s635_s17   ;;  %s809_s12 = smov %s619_s13 }
  0xfd   : > { %p13_p3 = scmp.ge.s32.totalorder %s16_s17, 4   ;;  %s810_s13 = smov %s623_s14 }
  0xfe   : > { %s811_s14 = smov %s714_s25  ;;  %s812_s15 = smov %s631_s16 }
  0xff   : > { %s813_s16 = smov %s815_s20  ;;  %15 = sbr.rel (!%p13_p3) target bundleno = 4 (0x4), region = 67 }
 0x104   :  { %380 = vsyncpa [#allocation3], 1 }
 0x105   :  { %382 = vsyncpa [#allocation3 + $0x1], 1 }

</bundles_post_ra>
